<compile_context>
chip_gen: v7x
topology: tpu7x:2x2x1
jax: 0.10.0
libtpu: 0.0.40
codegen_flags: <defaults>
</compile_context>

<pallas_src>
import functools

import jax
import jax.numpy as jnp
from jax.experimental import pallas as pl
from jax.experimental.pallas import tpu as pltpu


def duc_kernel(x_ref, w_ref, m_ref, o_ref, *, W):
    # x_ref: (Cin, H*W)   one image, spatially flattened (lane-dense)
    # w_ref: (Cout, Kp)   conv taps (tap-major, then cin) with BN scale folded
    #                     in, a bias column at index 9*Cin, zero-padded to Kp
    # m_ref: (9, H*W)     per-tap edge masks (1.0 inside, 0.0 = zero pad)
    # o_ref: (Cout, H*W)  conv + bn + relu output (pre pixel-shuffle)
    Cin, L = x_ref.shape
    Kp = w_ref.shape[1]

    x = x_ref[...].astype(jnp.float32)

    # In-register im2col via lane rotations + edge masks:
    #   patch[k*Cin + c, h*W + w] = x[c, h+dy-1, w+dx-1]  (0 outside),
    # with k = dy*3 + dx.  A roll by shift = (-(dy-1)*W - (dx-1)) mod L brings
    # the needed neighbour to lane p = h*W + w; the mask kills wrapped lanes.
    pieces = []
    for k in range(9):
        oy, ox = k // 3 - 1, k % 3 - 1
        shift = (-(oy * W + ox)) % L
        t = x if shift == 0 else pltpu.roll(x, shift, axis=1)
        if k != 4:                       # centre tap never reads padding
            t = t * m_ref[k:k + 1, :]
        pieces.append(t)

    # Bias row (all ones) + zero rows padding K up to a sublane multiple.
    pieces.append(jnp.ones((1, L), jnp.float32))
    pad = Kp - 9 * Cin - 1
    if pad > 0:
        pieces.append(jnp.zeros((pad, L), jnp.float32))

    patch = jnp.concatenate(pieces, axis=0)            # (Kp, L), in-register

    # Single K = Kp matmul; output is lane-dense (Cout, L); bias comes from
    # the ones-row, so the epilogue is just ReLU.
    y = jnp.dot(w_ref[...], patch, preferred_element_type=jnp.float32)
    o_ref[...] = jnp.maximum(y, 0.0).astype(o_ref.dtype)


def duc_forward(x_nchw, conv_w, gamma, beta, run_mean, run_var,
                upscale_factor=2, eps=1e-5):
    """x_nchw: (N, Cin, H, W). conv_w: (Cout, Cin, 3, 3) PyTorch layout."""
    N, Cin, H, W = x_nchw.shape
    Cout = conv_w.shape[0]
    r = upscale_factor
    HW = H * W

    # ---- one-time parameter folding (plain JAX) ----
    inv = gamma / jnp.sqrt(run_var + eps)
    # (Cout, Cin, 3, 3) -> (Cout, 3, 3, Cin) -> (Cout, 9*Cin); BN scale folded.
    w_taps = (jnp.transpose(conv_w, (0, 2, 3, 1)).reshape(Cout, 9 * Cin)
              * inv[:, None]).astype(jnp.float32)
    bias = ((beta - run_mean * inv)[:, None]).astype(jnp.float32)   # (Cout, 1)
    Kp = ((9 * Cin + 1 + 7) // 8) * 8                # pad K to 8-sublane tiles
    w_full = jnp.concatenate(
        [w_taps, bias, jnp.zeros((Cout, Kp - 9 * Cin - 1), jnp.float32)],
        axis=1)                                                     # (Cout, Kp)

    # Edge masks for the 9 taps (constants; 9*H*W floats, negligible traffic).
    hh, ww = jnp.meshgrid(jnp.arange(H), jnp.arange(W), indexing="ij")
    rows = []
    for k in range(9):
        oy, ox = k // 3 - 1, k % 3 - 1
        valid = ((hh + oy >= 0) & (hh + oy < H) &
                 (ww + ox >= 0) & (ww + ox < W))
        rows.append(valid.reshape(HW))
    mask_arr = jnp.stack(rows, axis=0).astype(jnp.float32)          # (9, HW)

    # Free (contiguous) reshape only — no NCHW->NHWC transpose, no padded copy.
    x_flat = x_nchw.reshape(N, Cin, HW)

    # ---- hot path: grid over the batch, one image per step ("parallel") ----
    conv_out = pl.pallas_call(
        functools.partial(duc_kernel, W=W),
        out_shape=jax.ShapeDtypeStruct((N, Cout, HW), x_nchw.dtype),
        grid_spec=pltpu.PrefetchScalarGridSpec(
            num_scalar_prefetch=0,
            grid=(N,),
            in_specs=[
                pl.BlockSpec((None, Cin, HW), lambda n: (n, 0, 0)),
                pl.BlockSpec((Cout, Kp), lambda n: (0, 0)),
                pl.BlockSpec((9, HW), lambda n: (0, 0)),
            ],
            out_specs=pl.BlockSpec((None, Cout, HW), lambda n: (n, 0, 0)),
        ),
        compiler_params=pltpu.CompilerParams(
            dimension_semantics=("parallel",)),
    )(x_flat, w_full, mask_arr)

    # ---- PixelShuffle: (N, Cout, H*W) -> (N, C, H*r, W*r) ----
    C = Cout // (r * r)
    y = conv_out.reshape(N, C, r, r, H, W)            # (n, c, i, j, h, w)
    y = jnp.transpose(y, (0, 1, 4, 2, 5, 3))          # (n, c, h, i, w, j)
    return y.reshape(N, C, H * r, W * r)


def _reference(x_nchw, conv_w, gamma, beta, run_mean, run_var,
               upscale_factor=2, eps=1e-5):
    """Pure-JAX reference of the PyTorch forward (eval-mode BN)."""
    y = jax.lax.conv_general_dilated(
        x_nchw.astype(jnp.float32), conv_w.astype(jnp.float32),
        window_strides=(1, 1), padding=((1, 1), (1, 1)),
        dimension_numbers=("NCHW", "OIHW", "NCHW"))
    inv = gamma / jnp.sqrt(run_var + eps)
    y = y * inv[None, :, None, None] + (beta - run_mean * inv)[None, :, None, None]
    y = jnp.maximum(y, 0.0)
    N, Cf, H, W = y.shape
    r = upscale_factor
    C = Cf // (r * r)
    y = y.reshape(N, C, r, r, H, W)
    y = jnp.transpose(y, (0, 1, 4, 2, 5, 3))
    return y.reshape(N, C, H * r, W * r)


if __name__ == "__main__":
    key = jax.random.PRNGKey(0)
    k_x, k_w, k_g, k_b, k_m, k_v = jax.random.split(key, 6)

    # DUC(inplanes=4, planes=16, upscale_factor=2) at small spatial size.
    N, Cin, H, W = 2, 4, 16, 16
    Cout, r = 16, 2

    x = jax.random.normal(k_x, (N, Cin, H, W), jnp.float32)
    conv_w = jax.random.normal(k_w, (Cout, Cin, 3, 3), jnp.float32) * 0.1
    gamma = 1.0 + 0.1 * jax.random.normal(k_g, (Cout,), jnp.float32)
    beta = 0.1 * jax.random.normal(k_b, (Cout,), jnp.float32)
    run_mean = 0.1 * jax.random.normal(k_m, (Cout,), jnp.float32)
    run_var = jax.random.uniform(k_v, (Cout,), jnp.float32, 0.5, 1.5)

    out = duc_forward(x, conv_w, gamma, beta, run_mean, run_var, upscale_factor=r)
    out = jax.block_until_ready(out)

    ref = _reference(x, conv_w, gamma, beta, run_mean, run_var, upscale_factor=r)
    assert out.shape == (N, Cout // (r * r), H * r, W * r), out.shape
    assert jnp.allclose(out, ref, atol=1e-4, rtol=1e-4), "mismatch vs reference"

    print("KERNEL_OK")
</pallas_src>

<mosaic_0001>
module attributes {stable_mosaic.version = 11 : i64} {
  func.func @duc_kernel(%arg0: i32, %arg1: memref<1x4x256xf32, #tpu.memory_space<vmem>>, %arg2: memref<16x40xf32, #tpu.memory_space<vmem>>, %arg3: memref<9x256xf32, #tpu.memory_space<vmem>>, %arg4: memref<1x16x256xf32, #tpu.memory_space<vmem>>) attributes {dimension_semantics = [#tpu.dimension_semantics<parallel>], iteration_bounds = array<i64: 2>, scalar_prefetch = 0 : i64, scratch_operands = 0 : i64, tpu.core_type = #tpu.core_type<tc>, window_params = [{transform_indices = @transform_0, window_bounds = array<i64: 1, 4, 256>}, {pipeline_mode = #tpu.pipeline_mode<synchronous>, transform_indices = @transform_1, window_bounds = array<i64: 16, 40>}, {pipeline_mode = #tpu.pipeline_mode<synchronous>, transform_indices = @transform_2, window_bounds = array<i64: 9, 256>}, {transform_indices = @transform_3, window_bounds = array<i64: 1, 16, 256>}]} {
    %c0 = arith.constant 0 : index
    %c0_0 = arith.constant 0 : index
    %c0_1 = arith.constant 0 : index
    %0 = vector.load %arg1[%c0, %c0_0, %c0_1] : memref<1x4x256xf32, #tpu.memory_space<vmem>>, vector<1x4x256xf32>
    %1 = vector.shape_cast %0 : vector<1x4x256xf32> to vector<4x256xf32>
    %c17_i32 = arith.constant 17 : i32
    %2 = tpu.dynamic_rotate %1 by %c17_i32 dim 1 : vector<4x256xf32>, i32 -> vector<4x256xf32>
    %c0_2 = arith.constant 0 : index
    %c0_3 = arith.constant 0 : index
    %3 = vector.load %arg3[%c0_2, %c0_3] : memref<9x256xf32, #tpu.memory_space<vmem>>, vector<1x256xf32>
    %4 = vector.broadcast %3 : vector<1x256xf32> to vector<4x256xf32>
    %5 = arith.mulf %2, %4 : vector<4x256xf32>
    %c16_i32 = arith.constant 16 : i32
    %6 = tpu.dynamic_rotate %1 by %c16_i32 dim 1 : vector<4x256xf32>, i32 -> vector<4x256xf32>
    %c1 = arith.constant 1 : index
    %c0_4 = arith.constant 0 : index
    %7 = vector.load %arg3[%c1, %c0_4] : memref<9x256xf32, #tpu.memory_space<vmem>>, vector<1x256xf32>
    %8 = vector.broadcast %7 : vector<1x256xf32> to vector<4x256xf32>
    %9 = arith.mulf %6, %8 : vector<4x256xf32>
    %c15_i32 = arith.constant 15 : i32
    %10 = tpu.dynamic_rotate %1 by %c15_i32 dim 1 : vector<4x256xf32>, i32 -> vector<4x256xf32>
    %c2 = arith.constant 2 : index
    %c0_5 = arith.constant 0 : index
    %11 = vector.load %arg3[%c2, %c0_5] : memref<9x256xf32, #tpu.memory_space<vmem>>, vector<1x256xf32>
    %12 = vector.broadcast %11 : vector<1x256xf32> to vector<4x256xf32>
    %13 = arith.mulf %10, %12 : vector<4x256xf32>
    %c1_i32 = arith.constant 1 : i32
    %14 = tpu.dynamic_rotate %1 by %c1_i32 dim 1 : vector<4x256xf32>, i32 -> vector<4x256xf32>
    %c3 = arith.constant 3 : index
    %c0_6 = arith.constant 0 : index
    %15 = vector.load %arg3[%c3, %c0_6] : memref<9x256xf32, #tpu.memory_space<vmem>>, vector<1x256xf32>
    %16 = vector.broadcast %15 : vector<1x256xf32> to vector<4x256xf32>
    %17 = arith.mulf %14, %16 : vector<4x256xf32>
    %c255_i32 = arith.constant 255 : i32
    %18 = tpu.dynamic_rotate %1 by %c255_i32 dim 1 : vector<4x256xf32>, i32 -> vector<4x256xf32>
    %c5 = arith.constant 5 : index
    %c0_7 = arith.constant 0 : index
    %19 = vector.load %arg3[%c5, %c0_7] : memref<9x256xf32, #tpu.memory_space<vmem>>, vector<1x256xf32>
    %20 = vector.broadcast %19 : vector<1x256xf32> to vector<4x256xf32>
    %21 = arith.mulf %18, %20 : vector<4x256xf32>
    %c241_i32 = arith.constant 241 : i32
    %22 = tpu.dynamic_rotate %1 by %c241_i32 dim 1 : vector<4x256xf32>, i32 -> vector<4x256xf32>
    %c6 = arith.constant 6 : index
    %c0_8 = arith.constant 0 : index
    %23 = vector.load %arg3[%c6, %c0_8] : memref<9x256xf32, #tpu.memory_space<vmem>>, vector<1x256xf32>
    %24 = vector.broadcast %23 : vector<1x256xf32> to vector<4x256xf32>
    %25 = arith.mulf %22, %24 : vector<4x256xf32>
    %c240_i32 = arith.constant 240 : i32
    %26 = tpu.dynamic_rotate %1 by %c240_i32 dim 1 : vector<4x256xf32>, i32 -> vector<4x256xf32>
    %c7 = arith.constant 7 : index
    %c0_9 = arith.constant 0 : index
    %27 = vector.load %arg3[%c7, %c0_9] : memref<9x256xf32, #tpu.memory_space<vmem>>, vector<1x256xf32>
    %28 = vector.broadcast %27 : vector<1x256xf32> to vector<4x256xf32>
    %29 = arith.mulf %26, %28 : vector<4x256xf32>
    %c239_i32 = arith.constant 239 : i32
    %30 = tpu.dynamic_rotate %1 by %c239_i32 dim 1 : vector<4x256xf32>, i32 -> vector<4x256xf32>
    %c8 = arith.constant 8 : index
    %c0_10 = arith.constant 0 : index
    %31 = vector.load %arg3[%c8, %c0_10] : memref<9x256xf32, #tpu.memory_space<vmem>>, vector<1x256xf32>
    %32 = vector.broadcast %31 : vector<1x256xf32> to vector<4x256xf32>
    %33 = arith.mulf %30, %32 : vector<4x256xf32>
    %cst = arith.constant 1.000000e+00 : f32
    %34 = vector.broadcast %cst : f32 to vector<1x256xf32>
    %cst_11 = arith.constant 0.000000e+00 : f32
    %35 = vector.broadcast %cst_11 : f32 to vector<3x256xf32>
    %36 = tpu.concatenate %5, %9, %13, %17, %1, %21, %25, %29, %33, %34, %35 in 0 : vector<4x256xf32>, vector<4x256xf32>, vector<4x256xf32>, vector<4x256xf32>, vector<4x256xf32>, vector<4x256xf32>, vector<4x256xf32>, vector<4x256xf32>, vector<4x256xf32>, vector<1x256xf32>, vector<3x256xf32> -> vector<40x256xf32>
    %c0_12 = arith.constant 0 : index
    %c0_13 = arith.constant 0 : index
    %37 = vector.load %arg2[%c0_12, %c0_13] : memref<16x40xf32, #tpu.memory_space<vmem>>, vector<16x40xf32>
    %cst_14 = arith.constant dense<0.000000e+00> : vector<16x256xf32>
    %38 = tpu.matmul %37, %36, %cst_14 {dimension_numbers = #tpu.dot_dimension_numbers<[1], [0], [0], [1], [0, 0, 1, 1], [], []>} : vector<16x40xf32>, vector<40x256xf32>, vector<16x256xf32> -> vector<16x256xf32>
    %cst_15 = arith.constant 0.000000e+00 : f32
    %39 = vector.broadcast %cst_15 : f32 to vector<16x256xf32>
    %40 = arith.maximumf %38, %39 : vector<16x256xf32>
    %c0_16 = arith.constant 0 : index
    %c0_17 = arith.constant 0 : index
    %c0_18 = arith.constant 0 : index
    %41 = vector.load %arg4[%c0_16, %c0_17, %c0_18] : memref<1x16x256xf32, #tpu.memory_space<vmem>>, vector<1x16x256xf32>
    %42 = vector.shape_cast %41 : vector<1x16x256xf32> to vector<16x256xf32>
    %43 = vector.shape_cast %40 : vector<16x256xf32> to vector<1x16x256xf32>
    tpu.vector_store %arg4[%c0_16, %c0_17, %c0_18], %43 {strides = array<i32>} : memref<1x16x256xf32, #tpu.memory_space<vmem>>, vector<1x16x256xf32>,
    return
  }
  func.func @transform_0(%arg0: i32) -> (i32, i32, i32) {
    %c0_i32 = arith.constant 0 : i32
    %c0_i32_0 = arith.constant 0 : i32
    %c0_i32_1 = arith.constant 0 : i32
    return %arg0, %c0_i32, %c0_i32_0 : i32, i32, i32
  }
  func.func @transform_1(%arg0: i32) -> (i32, i32) {
    %c0_i32 = arith.constant 0 : i32
    %c0_i32_0 = arith.constant 0 : i32
    %c0_i32_1 = arith.constant 0 : i32
    return %c0_i32, %c0_i32_0 : i32, i32
  }
  func.func @transform_2(%arg0: i32) -> (i32, i32) {
    %c0_i32 = arith.constant 0 : i32
    %c0_i32_0 = arith.constant 0 : i32
    %c0_i32_1 = arith.constant 0 : i32
    return %c0_i32, %c0_i32_0 : i32, i32
  }
  func.func @transform_3(%arg0: i32) -> (i32, i32, i32) {
    %c0_i32 = arith.constant 0 : i32
    %c0_i32_0 = arith.constant 0 : i32
    %c0_i32_1 = arith.constant 0 : i32
    return %arg0, %c0_i32, %c0_i32_0 : i32, i32, i32
  }
}

</mosaic_0001>

<bundles_post_ra>
// kernel: tpu_custom_call.1
= control target key start
LH: loop header
LB: loop body
LE: loop exit
PB: predicated region body
PF: predicated region fallthrough
CT: control target
= control target key end

     0   :  { %8 = vsyncpa [#allocation3], 0  ;;  %s1262_s0 = inlined_call_operand.hbm [shape: f32[2,4,256], index: 0, kind: input, shape index: {}]   ;;  %s1263_s1 = inlined_call_operand.hbm [shape: f32[16,40], index: 1, kind: input, shape index: {}]   ;;  %s1264_s2 = inlined_call_operand.hbm [shape: f32[9,256], index: 2, kind: input, shape index: {}]   ;;  %s1265_s3 = inlined_call_operand.hbm [shape: f32[2,16,256], index: 3, kind: output, shape index: {}]  }
   0x1   :  { %10 = vsyncpa [#allocation3 + $0x1], 0 }
   0x2   :  { %11 = vsyncpa [#allocation6], 0 }
   0x3   :  { %12 = vsyncpa [#allocation4], 0 }
   0x4   :  { %14 = vsyncpa [#allocation4 + $0x1], 0  ;;  %s951_s12 = smov 0   ;;  %s953_s13 = smov 0  }
   0x5   :  { %s955_s14 = smov 0   ;;  %s957_s15 = smov 0  }
   0x6 LB: > { %s972_s16 = sadd.s32 4294967295, %s911_s15   ;;  %s635_s17 = sadd.s32 4294967294, %s911_s15   ;;  %s911_s15 = sphi %s957_s15, %s1285_s15   ;;  %s907_s14 = sphi %s955_s14, %s1284_s14   ;;  %s903_s13 = sphi %s953_s13, %s1283_s13   ;;  %s899_s12 = sphi %s951_s12, %s1282_s12  }
   0x7   : > { %p40_p0 = scmp.ne.s32.totalorder %s903_s13, %s899_s12  ;;  %p1266_p1 = scmp.eq.s32.totalorder %s972_s16, 0 }
   0x8   : > { %p112_p3 = scmp.eq.s32.totalorder %s635_s17, 1  ;;  %p636_p5 = scmp.ge.s32.totalorder %s911_s15, 1 }
   0x9   : > { %p981_p4 = por %p1266_p1, %p40_p0  ;;  %p119_p7 = scmp.lt.s32.totalorder %s911_s15, 3 }
   0xa   : > { %p986_p6 = por %p112_p3, %p40_p0  ;;  %s913_s21 = smov [#allocation5]  }
   0xb   : > { %s1269_s18 = scalar_select %p981_p4, 1, 0 }
   0xc   : > { %s1270_s19 = scalar_select %p986_p6, 1, 0 }
   0xd   : > { %p991_p8 = pnand %p636_p5, %p119_p7  ;;  %s131_s22 = sshll.u32 %s913_s21, 4  ;;  %s995_s22 = int_to_ptr.vmem [resolvable:$true] %s131_s22 }
   0xe   : > { %s914_s24 = smov [#allocation7]   ;;  %s755_s28 = scalar_lea.hbm %s1263_s1, 256 }
   0xf   : > { %p685_p9 = pneg %p991_p8  ;;  %s144_s25 = sshll.u32 %s914_s24, 4  ;;  %s1006_s25 = int_to_ptr.vmem [resolvable:$true] %s144_s25 }
  0x10   : > { %p756_p12 = scmp.ne.s32.totalorder %s1263_s1, %s755_s28  ;;  %p762_p5 = scmp.lt.u32.totalorder %s755_s28, %s1263_s1 }
  0x11   : > { %p1002_p11 = pnand %p685_p9, %p1266_p1 }
  0x13   : > { %p757_p13 = pneg %p1002_p11 }
  0x15   : > { %p758_p0 = pnand %p757_p13, %p756_p12 }
  0x17   : > { %p759_p3 = pneg %p758_p0 }
  0x19   : > { %p764_p7 = pnand %p762_p5, %p759_p3 }
  0x1b   : > { %767 = shalt.err (!%p764_p7)
}
  0x1c   : > { %s768_s6 = scalar_lea.vmem %s995_s22, 256  ;;  %p776_p2 = scmp.lt.s32.totalorder %s995_s22, %s995_s22 }
  0x1d   : > { %p769_p9 = scmp.ne.s32.totalorder %s995_s22, %s768_s6  ;;  %p777_p12 = scmp.lt.s32.totalorder %s768_s6, %s768_s6 }
  0x1f   : > { %p771_p10 = pnand %p769_p9, %p757_p13  ;;  %p778_p0 = por %p777_p12, %p776_p2 }
  0x21   : > { %p772_p1 = pneg %p771_p10 }
  0x23   : > { %p779_p6 = pnand %p778_p0, %p772_p1 }
  0x25   : > { %782 = shalt.err (!%p779_p6)
}
  0x26   : > { %s915_s7 = smov 128   ;;  %s916_s8 = smov 8  }
  0x27   : > { %688 = dma.hbm_to_vmem [thread:$0]  (!%p1002_p11), %s1263_s1, 256, %s995_s22, [#allocation6], %s915_s7, %s915_s7, %s916_s8  }
  0x28   : > { %s783_s21 = scalar_lea.hbm %s1264_s2, 512 }
  0x29   : > { %p784_p2 = scmp.ne.s32.totalorder %s1264_s2, %s783_s21  ;;  %p790_p10 = scmp.lt.u32.totalorder %s783_s21, %s1264_s2 }
  0x2b   : > { %p786_p1 = pnand %p784_p2, %p757_p13 }
  0x2d   : > { %p787_p6 = pneg %p786_p1 }
  0x2f   : > { %p792_p3 = pnand %p790_p10, %p787_p6 }
  0x31   : > { %795 = shalt.err (!%p792_p3)
}
  0x32   : > { %s796_s22 = scalar_lea.vmem %s1006_s25, 512  ;;  %p804_p12 = scmp.lt.s32.totalorder %s1006_s25, %s1006_s25 }
  0x33   : > { %p797_p5 = scmp.ne.s32.totalorder %s1006_s25, %s796_s22  ;;  %p805_p0 = scmp.lt.s32.totalorder %s796_s22, %s796_s22 }
  0x35   : > { %p799_p7 = pnand %p797_p5, %p757_p13  ;;  %p806_p2 = por %p805_p0, %p804_p12 }
  0x37   : > { %p800_p9 = pneg %p799_p7 }
  0x39   : > { %p807_p1 = pnand %p806_p2, %p800_p9 }
  0x3b   : > { %810 = shalt.err (!%p807_p1)
}
  0x3c   : > { %s917_s29 = smov 256   ;;  %s918_s30 = smov 16  }
  0x3d   : > { %691 = dma.hbm_to_vmem [thread:$0]  (!%p1002_p11), %s1264_s2, 512, %s1006_s25, [#allocation6], %s917_s29, %s917_s29, %s918_s30  }
  0x3e   : > { %s1061_s6 = sadd.s32 1, %s911_s15   ;;  %s27_s8 = sadd.s32 1, %s907_s14 }
  0x3f   : > { %s24_s7 = ssub.s32 %s911_s15, %s1061_s6  ;;  %p34_p6 = scmp.ne.s32.totalorder %s907_s14, %s903_s13 }
  0x40   : > { %p25_p13 = scmp.eq.s32.totalorder %s24_s7, 0  ;;  %p35_p10 = scmp.eq.s32.totalorder %s911_s15, 0 }
  0x41   : > { %p1273_p5 = scmp.eq.s32.totalorder %s972_s16, 1  ;;  %p702_p9 = scmp.lt.s32.totalorder %s911_s15, 2 }
  0x42   : > { %s1070_s9 = scalar_select %p25_p13, %s907_s14, %s27_s8  }
  0x43   : > { %p36_p3 = por %p35_p10, %p34_p6  ;;  %p1074_p7 = por %p1273_p5, %p34_p6 }
  0x44   : > { %s158_s23 = sand.u32 1, %s907_s14   ;;  %s657_s25 = sshll.u32 %s911_s15, 7 }
  0x45   : > { %s1274_s10 = scalar_select %p1074_p7, 1, 0 }
  0x46   : > { %s640_s11 = sshll.u32 %s158_s23, 3  ;;  %s1084_s24 = scalar_lea.hbm %s1262_s0, %s657_s25 }
  0x47   : > { %s162_s26 = scalar_lea.vmem [#allocation2], %s640_s11  ;;  %p1088_p11 = pnand %p702_p9, %p36_p3 }
  0x48   : > { %s170_s27 = sshll.u32 %s162_s26, 4  ;;  %s159_s22 = scalar_lea.sflag [#allocation3], %s158_s23  ;;  %s1086_s27 = int_to_ptr.vmem [resolvable:$true] %s170_s27 }
  0x49   : > { %s811_s29 = scalar_lea.hbm %s1084_s24, 128  ;;  %p813_p0 = pneg %p1088_p11 }
  0x4a   : > { %p812_p12 = scmp.ne.s32.totalorder %s1084_s24, %s811_s29  ;;  %s816_s5 = scalar_lea.hbm %s1262_s0, 256 }
  0x4b   : > { %p817_p13 = scmp.lt.u32.totalorder %s1084_s24, %s1262_s0  ;;  %p818_p6 = scmp.lt.u32.totalorder %s816_s5, %s811_s29 }
  0x4c   : > { %p814_p2 = pnand %p813_p0, %p812_p12  ;;  %p820_p3 = scmp.lt.u32.totalorder %s811_s29, %s1084_s24 }
  0x4d   : > { %p819_p10 = por %p818_p6, %p817_p13 }
  0x4e   : > { %p815_p1 = pneg %p814_p2 }
  0x4f   : > { %p821_p5 = por %p820_p3, %p819_p10 }
  0x51   : > { %p822_p9 = pnand %p821_p5, %p815_p1 }
  0x53   : > { %825 = shalt.err (!%p822_p9)
}
  0x54   : > { %s826_s23 = scalar_lea.vmem %s1086_s27, 128  ;;  %s919_s11 = smov [#allocation2]  }
  0x55   : > { %p827_p12 = scmp.ne.s32.totalorder %s1086_s27, %s826_s23  ;;  %s831_s25 = sshll.u32 %s919_s11, 4  ;;  %s832_s25 = int_to_ptr.vmem [resolvable:$false] %s831_s25 }
  0x56   : > { %s833_s17 = scalar_lea.vmem %s832_s25, 256  ;;  %p834_p4 = scmp.lt.s32.totalorder %s1086_s27, %s832_s25 }
  0x57   : > { %p829_p2 = pnand %p827_p12, %p813_p0  ;;  %p835_p13 = scmp.lt.s32.totalorder %s833_s17, %s826_s23 }
  0x59   : > { %p830_p7 = pneg %p829_p2  ;;  %p836_p6 = por %p835_p13, %p834_p4 }
  0x5b   : > { %p837_p10 = pnand %p836_p6, %p830_p7 }
  0x5d   : > { %840 = shalt.err (!%p837_p10)
}
  0x5e   : > { %695 = dma.hbm_to_vmem [thread:$0]  (!%p1088_p11), %s1084_s24, 128, %s1086_s27, %s159_s22  }
  0x5f   : > { %179 = sbr.rel (%p991_p8) target bundleno = 488 (0x1e8), region = 32  ;;  %s1120_s21 = sand.u32 (!%p991_p8), 1, %s903_s13  }
  0x60   : > { %s644_s26 = sshll.u32 (!%p991_p8), %s1120_s21, 3  ;;  %s182_s29 = scalar_lea.sflag (!%p991_p8), [#allocation3], %s1120_s21 }
  0x61   : > { %s185_s30 = scalar_lea.vmem (!%p991_p8), [#allocation2], %s644_s26  ;;  %p1276_p4 = scmp.ne.s32.totalorder (!%p991_p8), %s1269_s18, 0 }
  0x66   : > { %886 = dma.done.wait (%p1276_p4), %s182_s29, 128  }
  0x67   : > { %888 = vsyncadd (%p1276_p4), %s182_s29, 4294967168  ;;  %p1277_p7 = scmp.eq.s32.totalorder %s972_s16, 0 }
  0x69   : > { %890 = dma.done.wait (%p1277_p7), [#allocation6], 768   ;;  %p1278_p11 = pmov %p1277_p7 }
  0x6a   : > { %v1132_v0 = vld [vmem:[%s185_s30] sm:$0xff]  ;;  %s920_s20 = smov 1   ;;  %s921_s24 = smov 16   ;;  %v926_v2 = vmov 0.0   ;;  %v224_v3 = vlaneseq  ;;  %vm421_vm4 = vcmask 1043456   ;;  %vm432_vm9 = vcmask 1044480  }
  0x6b   : > { %892 = vsyncadd (%p1278_p11), [#allocation6], 4294966528  ;;  %287 = vrot.lane.b32.xlu1 %v1132_v0, %s920_s20  ;;  %243 = vrot.lane.b32.xlu0 %v1132_v0, %s921_s24  ;;  %v1139_v1 = vcombine.high %v1132_v0, %v1132_v0  ;;  %s922_s18 = smov 17   ;;  %s923_s27 = smov 15   ;;  %vm437_vm10 = vcmask 326656  }
  0x6c   : > { %s924_s28 = smov 127   ;;  %s925_s22 = smov 112   ;;  %508 = vmatprep.mubr.f32.mxu0 %v926_v2  ;;  %514 = vmatprep.mubr.f32.mxu1 %v926_v2  ;;  %v232_v4 = vshrl.u32 %v224_v3, 7  ;;  %v1156_v5 = vand.u32 127, %v224_v3 }
  0x6d   : > { %s927_s4 = smov 113   ;;  %s928_s5 = smov 111   ;;  %v295_v10 = vld [vmem:[#allocation7 + $0x3] ss:$8 sm:$0x3] }
  0x6e   : > { %v1158_v8 = vsub.s32 0, %v232_v4  ;;  %v1160_v9 = vsub.s32 1, %v232_v4  ;;  %vm291_vm0 = vcmp.lt.s32.totalorder %v1156_v5, 1  ;;  %v251_v11 = vld [vmem:[#allocation7 + $0x1] ss:$8 sm:$0x3] }
  0x6f   : > { %220 = vrot.lane.b32.xlu0 %v1132_v0, %s922_s18  ;;  %289 = vrot.lane.b32.xlu1 %v1139_v1, %s920_s20  ;;  %v229_v16 = vld [vmem:[#allocation7] ss:$8 sm:$0x3]  ;;  %vm247_vm1 = vcmp.lt.s32.totalorder %v1156_v5, 16  ;;  %vm226_vm2 = vcmp.lt.s32.totalorder %v1156_v5, 17  ;;  %vm269_vm3 = vcmp.lt.s32.totalorder %v1156_v5, 15 }
  0x70   : > { %v300_v14 = vrot.slane %v295_v10, %v1158_v8  ;;  %v304_v15 = vrot.slane %v295_v10, %v1160_v9  ;;  %v256_v19 = vrot.slane %v251_v11, %v1158_v8  ;;  %v260_v20 = vrot.slane %v251_v11, %v1160_v9  ;;  %v273_v21 = vld [vmem:[#allocation7 + $0x2] ss:$8 sm:$0x3]  ;;  %v317_v40 = vld [vmem:[#allocation7 + $0x5] ss:$8 sm:$0x3] }
  0x71   : > { %v234_v22 = vrot.slane %v229_v16, %v1158_v8  ;;  %v238_v23 = vrot.slane %v229_v16, %v1160_v9  ;;  %v278_v32 = vrot.slane %v273_v21, %v1158_v8  ;;  %v282_v33 = vrot.slane %v273_v21, %v1160_v9  ;;  %v361_v51 = vld [vmem:[#allocation7 + $0x7] ss:$8 sm:$0x3]  ;;  %v339_v2 = vld [vmem:[#allocation7 + $0x6] ss:$8 sm:$0x3] }
  0x72   : > { %vm313_vm5 = vcmp.lt.s32.totalorder %v1156_v5, 127  ;;  %v322_v49 = vrot.slane %v317_v40, %v1158_v8  ;;  %v326_v50 = vrot.slane %v317_v40, %v1160_v9  ;;  %vm357_vm6 = vcmp.lt.s32.totalorder %v1156_v5, 112  ;;  %v383_v16 = vld [vmem:[#allocation7 + $0x10] ss:$8 sm:$0x3]  ;;  %s647_s7 = sshll.u32 %s1120_s21, 5 }
  0x73   : > { %222 = vrot.lane.b32.xlu1 %v1139_v1, %s922_s18  ;;  %245 = vrot.lane.b32.xlu0 %v1139_v1, %s921_s24  ;;  %v366_v62 = vrot.slane %v361_v51, %v1158_v8  ;;  %v370_v63 = vrot.slane %v361_v51, %v1160_v9  ;;  %vm335_vm7 = vcmp.lt.s32.totalorder %v1156_v5, 113  ;;  %vm379_vm8 = vcmp.lt.s32.totalorder %v1156_v5, 111  ;;  %v436_v5 = vld [vmem:[#allocation5 + $0x8] sm:$0xff]  ;;  %s215_s8 = scalar_lea.vmem [#allocation8], %s647_s7  ;;  %s658_s11 = sshll.u32 %s972_s16, 9 }
  0x74   : > { %s543_s23 = sshll.u32 %s215_s8, 4  ;;  %s1217_s26 = scalar_lea.hbm %s1265_s3, %s658_s11  ;;  %s1212_s23 = int_to_ptr.vmem [resolvable:$true] %s543_s23 }
  0x75   : > { %s530_s16 = scalar_lea.sflag [#allocation4], %s1120_s21  ;;  %s841_s29 = scalar_lea.vmem %s1212_s23, 512 }
  0x76   : > { %p842_p8 = scmp.ne.s32.totalorder %s1212_s23, %s841_s29  ;;  %p1279_p0 = scmp.ne.s32.totalorder %s1274_s10, 0 }
  0x77   : > { %267 = vrot.lane.b32.xlu1 %v1139_v1, %s923_s27  ;;  %265 = vrot.lane.b32.xlu0 %v1132_v0, %s923_s27  ;;  %s929_s30 = smov [#allocation8]  }
  0x78   : > { %p843_p1 = pnand %p842_p8, %p1279_p0  ;;  %s845_s20 = sshll.u32 %s929_s30, 4  ;;  %s846_s20 = int_to_ptr.vmem [resolvable:$false] %s845_s20 }
  0x79   : > { %s847_s18 = scalar_lea.vmem %s846_s20, 1024  ;;  %p848_p5 = scmp.lt.s32.totalorder %s1212_s23, %s846_s20 }
  0x7a   : > { %p844_p3 = pneg %p843_p1  ;;  %p849_p9 = scmp.lt.s32.totalorder %s847_s18, %s841_s29 }
  0x7b   : > { %311 = vrot.lane.b32.xlu1 %v1139_v1, %s924_s28  ;;  %309 = vrot.lane.b32.xlu0 %v1132_v0, %s924_s28 }
  0x7c   : > { %p850_p12 = por %p849_p9, %p848_p5 }
  0x7e   : > { %p851_p2 = pnand %p850_p12, %p844_p3 }
  0x7f   : > { %355 = vrot.lane.b32.xlu1 %v1139_v1, %s925_s22  ;;  %353 = vrot.lane.b32.xlu0 %v1132_v0, %s925_s22 }
  0x83   : > { %333 = vrot.lane.b32.xlu1 %v1139_v1, %s927_s4  ;;  %331 = vrot.lane.b32.xlu0 %v1132_v0, %s927_s4 }
  0x87   : > { %377 = vrot.lane.b32.xlu1 %v1139_v1, %s928_s5  ;;  %375 = vrot.lane.b32.xlu0 %v1132_v0, %s928_s5 }
  0xdd   : > { %v288_v6 = vpop.permute.xlu1 %287  ;;  %v244_v7 = vpop.permute.xlu0 %243 }
  0xe1   : > { %v221_v12 = vpop.permute.xlu0 %220  ;;  %v290_v13 = vpop.permute.xlu1 %289 }
  0xe2   : > { %v292_v17 = vsel %vm291_vm0, %v288_v6, %v290_v13  ;;  %v293_v18 = vsel %vm291_vm0, %v290_v13, %v288_v6 }
  0xe3   : > { %v307_v26 = vmul.f32 %v300_v14, %v293_v18  ;;  %v308_v27 = vmul.f32 %v304_v15, %v292_v17  ;;  %v344_v14 = vrot.slane %v339_v2, %v1158_v8  ;;  %v348_v15 = vrot.slane %v339_v2, %v1160_v9 }
  0xe5   : > { %v223_v24 = vpop.permute.xlu1 %222  ;;  %v246_v25 = vpop.permute.xlu0 %245  ;;  %v405_v41 = vrot.slane %v307_v26, 4  ;;  %v406_v42 = vrot.slane %v308_v27, 4 }
  0xe6   : > { %v248_v28 = vsel %vm247_vm1, %v244_v7, %v246_v25  ;;  %v249_v29 = vsel %vm247_vm1, %v246_v25, %v244_v7  ;;  %v227_v34 = vsel %vm226_vm2, %v221_v12, %v223_v24  ;;  %v228_v35 = vsel %vm226_vm2, %v223_v24, %v221_v12 }
  0xe7   : > { %v263_v30 = vmul.f32 %v256_v19, %v249_v29  ;;  %v264_v31 = vmul.f32 %v260_v20, %v248_v28  ;;  %v241_v45 = vmul.f32 %v234_v22, %v228_v35  ;;  %v242_v46 = vmul.f32 %v238_v23, %v227_v34 }
  0xe8   : > { %v388_v23 = vrot.slane %v383_v16, %v1158_v8  ;;  %v392_v24 = vrot.slane %v383_v16, %v1160_v9 }
  0xe9   : > { %v399_v36 = vrot.slane %v263_v30, 4  ;;  %v400_v37 = vrot.slane %v264_v31, 4  ;;  %v268_v38 = vpop.permute.xlu1 %267  ;;  %v266_v39 = vpop.permute.xlu0 %265 }
  0xea   : > { %v270_v43 = vsel %vm269_vm3, %v266_v39, %v268_v38  ;;  %v271_v44 = vsel %vm269_vm3, %v268_v38, %v266_v39  ;;  %v435_v39 = vld [vmem:[#allocation5] sm:$0xff] }
  0xeb   : > { %v285_v47 = vmul.f32 %v278_v32, %v271_v44  ;;  %v286_v48 = vmul.f32 %v282_v33, %v270_v43  ;;  %v423_v54 = vsel %vm421_vm4, %v242_v46, %v400_v37  ;;  %v422_v56 = vsel %vm421_vm4, %v241_v45, %v399_v36 }
  0xed   : > { %v312_v52 = vpop.permute.xlu1 %311  ;;  %v310_v53 = vpop.permute.xlu0 %309  ;;  %v425_v55 = vsel %vm421_vm4, %v286_v48, %v406_v42  ;;  %v424_v57 = vsel %vm421_vm4, %v285_v47, %v405_v41 }
  0xee   : > { %v314_v58 = vsel %vm313_vm5, %v310_v53, %v312_v52  ;;  %v315_v59 = vsel %vm313_vm5, %v312_v52, %v310_v53  ;;  %v659_v60 = vpack.c.bf16 %v425_v55, %v423_v54  ;;  %v661_v61 = vpack.c.bf16 %v424_v57, %v422_v56 }
  0xef   : > { %v329_v3 = vmul.f32 %v322_v49, %v314_v58  ;;  %v330_v4 = vmul.f32 %v326_v50, %v315_v59 }
  0xf0   : > { %660 = vmatprep.subr.bf16.mxu0 %v659_v60  ;;  %667 = vmatprep.subr.bf16.mxu1 %v659_v60 }
  0xf1   : > { %v356_v6 = vpop.permute.xlu1 %355  ;;  %662 = vmatpush1.bf16.msra.mxu0 %v661_v61  ;;  %670 = vmatpush1.bf16.msra.mxu1 %v661_v61  ;;  %v354_v7 = vpop.permute.xlu0 %353  ;;  %v411_v17 = vrot.slane %v329_v3, 4  ;;  %v412_v18 = vrot.slane %v330_v4, 4 }
  0xf2   : > { %v358_v10 = vsel %vm357_vm6, %v354_v7, %v356_v6  ;;  %v359_v11 = vsel %vm357_vm6, %v356_v6, %v354_v7 }
  0xf3   : > { %v373_v12 = vmul.f32 %v366_v62, %v358_v10  ;;  %v374_v13 = vmul.f32 %v370_v63, %v359_v11  ;;  %v427_v31 = vsel %vm421_vm4, %v1139_v1, %v412_v18  ;;  %v426_v33 = vsel %vm421_vm4, %v1132_v0, %v411_v17 }
  0xf5   : > { %v334_v19 = vpop.permute.xlu1 %333  ;;  %v332_v20 = vpop.permute.xlu0 %331  ;;  %v417_v25 = vrot.slane %v373_v12, 4  ;;  %v418_v26 = vrot.slane %v374_v13, 4 }
  0xf6   : > { %v336_v21 = vsel %vm335_vm7, %v332_v20, %v334_v19  ;;  %v337_v22 = vsel %vm335_vm7, %v334_v19, %v332_v20 }
  0xf7   : > { %v351_v27 = vmul.f32 %v344_v14, %v336_v21  ;;  %v352_v28 = vmul.f32 %v348_v15, %v337_v22 }
  0xf9   : > { %v378_v29 = vpop.permute.xlu1 %377  ;;  %v376_v30 = vpop.permute.xlu0 %375  ;;  %v429_v32 = vsel %vm421_vm4, %v352_v28, %v418_v26  ;;  %v428_v34 = vsel %vm421_vm4, %v351_v27, %v417_v25 }
  0xfa   : > { %v380_v8 = vsel %vm379_vm8, %v376_v30, %v378_v29  ;;  %v381_v9 = vsel %vm379_vm8, %v378_v29, %v376_v30  ;;  %v663_v35 = vpack.c.bf16 %v429_v32, %v427_v31  ;;  %v665_v36 = vpack.c.bf16 %v428_v34, %v426_v33 }
  0xfb   : > { %v395_v37 = vmul.f32 %v388_v23, %v380_v8  ;;  %v396_v38 = vmul.f32 %v392_v24, %v381_v9 }
  0xfc   : > { %664 = vmatprep.subr.bf16.mxu0 %v663_v35  ;;  %668 = vmatprep.subr.bf16.mxu1 %v663_v35 }
  0xfd   : > { %666 = vmatpush1.bf16.msra.mxu0 %v665_v36  ;;  %671 = vmatpush1.bf16.msra.mxu1 %v665_v36  ;;  %v431_v0 = vsel %vm421_vm4, %v396_v38, 1.0  ;;  %v430_v1 = vsel %vm421_vm4, %v395_v37, 1.0 }
  0xfe   : > { %648 = vmatprep.subr.msk.mxu0 %vm432_vm9, %v431_v0  ;;  %669 = vmatprep.subr.msk.mxu1 %vm432_vm9, %v431_v0 }
 0x101   : > { %649 = vmatpush1.msk.msra.mxu0 %vm432_vm9, %v430_v1  ;;  %672 = vmatpush1.msk.msra.mxu1 %vm432_vm9, %v430_v1 }
 0x102   : > { %650 = vmatmul.mubr.msk.f32.vlgmr.msra.gmra.mrb[0].mxu0 %vm437_vm10, %v435_v39  ;;  %651 = vmatmul.mubr.msk.f32.vlgmr.msra.gmra.mrb[0].mxu1 %vm437_vm10, %v436_v5 }
 0x1d5   : > { %v510_v40 = vpop.f32.mrb[0].mxu0  ;;  %v516_v41 = vpop.f32.mrb[0].mxu1 }
 0x1d6   : > { %v521_v42 = vmax.f32 %v510_v40, 0.0  ;;  %v523_v43 = vmax.f32 %v516_v41, 0.0  ;;  %v512_v44 = vpop.f32.mrb[1].mxu0  ;;  %v518_v45 = vpop.f32.mrb[1].mxu1 }
 0x1d7   : > { %v522_v46 = vmax.f32 %v512_v44, 0.0  ;;  %v524_v47 = vmax.f32 %v518_v45, 0.0 }
 0x1d8   : > { %525 = vst [vmem:[%s215_s8] sm:$0xff] %v521_v42  ;;  %527 = vst [vmem:[%s215_s8 + $0x10] sm:$0xff] %v523_v43 }
 0x1d9   : > { %526 = vst [vmem:[%s215_s8 + $0x8] sm:$0xff] %v522_v46  ;;  %528 = vst [vmem:[%s215_s8 + $0x18] sm:$0xff] %v524_v47 }
 0x1da   : > { %854 = shalt.err (!%p851_p2)
}
 0x1db   : > { %s855_s27 = scalar_lea.hbm %s1217_s26, 512  ;;  %s859_s4 = scalar_lea.hbm %s1265_s3, 1024 }
 0x1dc   : > { %p856_p13 = scmp.ne.s32.totalorder %s1217_s26, %s855_s27  ;;  %p860_p4 = scmp.lt.u32.totalorder %s1217_s26, %s1265_s3 }
 0x1dd   : > { %p861_p7 = scmp.lt.u32.totalorder %s859_s4, %s855_s27  ;;  %p863_p8 = scmp.lt.u32.totalorder %s855_s27, %s1217_s26 }
 0x1de   : > { %p857_p6 = pnand %p856_p13, %p1279_p0 }
 0x1df   : > { %p862_p11 = por %p861_p7, %p860_p4 }
 0x1e0   : > { %p858_p10 = pneg %p857_p6 }
 0x1e1   : > { %p864_p1 = por %p863_p8, %p862_p11 }
 0x1e3   : > { %p865_p3 = pnand %p864_p1, %p858_p10 }
 0x1e5   : > { %868 = shalt.err (!%p865_p3)
}
 0x1e6   : > { %s930_s8 = smov 256  }
 0x1e7   : > { %683 = dma.vmem_to_hbm [thread:$0]  (%p1279_p0), %s1212_s23, 512, %s1217_s26, %s530_s16, %s930_s8, %s930_s8, %s921_s24  }
 0x1e8 PF: > { %s558_s11 = sand.u32 1, %s899_s12   ;;  %p1280_p5 = scmp.ne.s32.totalorder %s1270_s19, 0 }
 0x1e9   : > { %p1281_p9 = scmp.ge.s32.totalorder %s911_s15, 2  ;;  %s559_s25 = scalar_lea.sflag [#allocation4], %s558_s11 }
 0x1eb   : > { %p697_p12 = pnand %p1281_p9, %p1280_p5 }
 0x1ed   : > { %894 = dma.done.wait (!%p697_p12), %s559_s25, 512  }
 0x1ee   : > { %896 = vsyncadd (!%p697_p12), %s559_s25, 4294966784  ;;  %p17_p2 = scmp.ge.s32.totalorder %s1061_s6, 4   ;;  %s1282_s12 = smov %s903_s13 }
 0x1ef   : > { %s1283_s13 = smov %s907_s14  ;;  %s1284_s14 = smov %s1070_s9 }
 0x1f0   : > { %s1285_s15 = smov %s1061_s6  ;;  %19 = sbr.rel (!%p17_p2) target bundleno = 6 (0x6), region = 92 }
 0x1f7   :  { %564 = vsyncpa [#allocation3], 1 }
 0x1f8   :  { %566 = vsyncpa [#allocation3 + $0x1], 1 }
 0x1f9   :  { %567 = vsyncpa [#allocation6], 1 }
 0x1fa   :  { %568 = vsyncpa [#allocation4], 1 }
 0x1fb   :  { %570 = vsyncpa [#allocation4 + $0x1], 1 }

</bundles_post_ra>
